<compile_context>
chip_gen: v7x
topology: tpu7x:2x2x1
jax: 0.10.0
libtpu: 0.0.40
codegen_flags: <defaults>
</compile_context>

<pallas_src>
import functools

import jax
import jax.numpy as jnp
from jax.experimental import pallas as pl
from jax.experimental.pallas import tpu as pltpu

_LANES = 128   # lanes per vreg row of the view: 64 (pos, neg) pairs
_ROW_Q = 32    # block-height quantum for multi-block tiling (int8 tile = (32, 128))


@functools.lru_cache(maxsize=1)
def _num_tensorcores() -> int:
    """Best-effort TensorCore count (2 on v7x, 1 on v5e/v6e); defaults to 1."""
    get_info = getattr(pltpu, "get_tpu_info", None)
    if get_info is None:
        return 1
    try:
        info = get_info()
    except Exception:
        return 1
    for name in ("num_cores", "core_count", "num_tensorcores", "tensorcore_count"):
        val = getattr(info, name, None)
        if isinstance(val, int) and val >= 1:
            return val
    return 1


def _pick_layout(rows: int, target_rows: int, num_tc: int):
    """Choose (block_rows, num_parts, blocks_per_part, padded_rows) for the
    (rows, 128) lane-dense view, keeping every block tile-legal for f32 and int8."""
    if rows > 0 and rows % _ROW_Q == 0:
        cap = max(_ROW_Q, (min(target_rows, rows) // _ROW_Q) * _ROW_Q)
        # Largest _ROW_Q-multiple block height <= cap dividing rows exactly (no pad).
        br = next((c for c in range(cap, _ROW_Q - 1, -_ROW_Q) if rows % c == 0), 0)
        if br > 0 and 2 * br >= cap:
            blocks = rows // br
            parts = num_tc if (num_tc > 1 and blocks % num_tc == 0) else 1
            return br, parts, blocks // parts, rows
    if rows <= target_rows:
        # One full-height block (block == full array dims is always layout-legal);
        # round to a multiple of 8 so the in-kernel (.., 8, 128) reduce is exact.
        rp = max(8, ((rows + 7) // 8) * 8)
        return rp, 1, 1, rp
    # Ragged large input: pad the row count up to a whole number of blocks.
    br = max(_ROW_Q, (min(target_rows, rows) // _ROW_Q) * _ROW_Q)
    blocks = pl.cdiv(rows, br)
    parts = num_tc if (num_tc > 1 and blocks >= num_tc) else 1
    bpp = pl.cdiv(blocks, parts)
    return br, parts, bpp, parts * bpp * br


def _contrastive_loss_kernel(scores_ref, labels_ref, out_ref, *, use_mrl: bool):
    # scores_ref: (br, 128) float, lanes interleaved [pos0, neg0, pos1, neg1, ...]
    # labels_ref: (br, 128) int8, (y, 0) per pair -> odd / padded lanes are 0.
    # out_ref:    (8, 128) f32 per-part accumulator, VMEM-resident across the
    #             "arbitrary" reduction axis.
    j = pl.program_id(1)

    @pl.when(j == 0)
    def _init():
        out_ref[...] = jnp.zeros_like(out_ref)

    s = scores_ref[...].astype(jnp.float32)
    y = labels_ref[...].astype(jnp.float32)        # even lanes: +/-1; odd/pad: 0

    # rolled[r, c] = s[r, (c + 1) % 128]: at even lanes this is the paired neg score
    # (pairs never straddle rows, and the lane-127 wrap only hits masked odd lanes).
    rolled = pltpu.roll(s, shift=s.shape[1] - 1, axis=1)
    # x = -y * (pos - neg) = y * (neg - pos); odd and padded lanes have y == 0.
    x = (rolled - s) * y

    if use_mrl:
        v = jnp.maximum(x, 0.0)                    # margin = 0; masked lanes stay 0
    else:
        # numerically stable softplus log(1 + exp(x)); the x == 0 (masked) lanes
        # would contribute log(2), so keep one select on the label mask.
        v = jnp.maximum(x, 0.0) + jnp.log1p(jnp.exp(-jnp.abs(x)))
        v = jnp.where(y != 0.0, v, 0.0)

    # Vreg-shaped partial sum: sublane-group adds only (pure VPU, no XLU reduce,
    # no serialized scalar read-modify-write), hidden under the next block's DMA.
    out_ref[...] += jnp.sum(v.reshape(-1, 8, v.shape[1]), axis=0)


def contrastive_loss(scores: jax.Array, labels: jax.Array, *,
                     use_mrl: bool = True, block_rows: int = 4096) -> jax.Array:
    """scores: [N, 2] float, labels: [N] int in {1, -1}. Returns scalar f32 loss."""
    n, c = scores.shape
    assert c == 2 and labels.shape == (n,)
    # TODO(synk): the PyTorch module's runtime assert that labels are exactly
    # {1, -1} is assumed to hold upstream; a stray 0 label silently drops out of
    # the mean instead of raising.

    rows = pl.cdiv(2 * n, _LANES)
    br, num_parts, bpp, rows_p = _pick_layout(rows, block_rows, _num_tensorcores())
    flat_len = rows_p * _LANES

    # Label lane encoding: (y, 0) per (pos, neg) pair as int8 — 2 bytes/sample.
    labels_pair = jnp.stack(
        [labels.astype(jnp.int8), jnp.zeros((n,), jnp.int8)], axis=-1)   # (n, 2)

    scores_flat = scores.reshape(2 * n)            # free view of contiguous [N, 2]
    labels_flat = labels_pair.reshape(2 * n)
    if flat_len != 2 * n:
        # TODO(synk): ragged N pays one wrapper-side pad copy; "nice" N (e.g.
        # N % 512 == 0 with a dividing block decomposition) takes the copy-free path.
        scores_flat = jnp.pad(scores_flat, (0, flat_len - 2 * n))
        labels_flat = jnp.pad(labels_flat, (0, flat_len - 2 * n))
    scores_view = scores_flat.reshape(rows_p, _LANES)
    labels_view = labels_flat.reshape(rows_p, _LANES)

    in_map = lambda p, j: (p * bpp + j, 0)
    partials = pl.pallas_call(
        functools.partial(_contrastive_loss_kernel, use_mrl=use_mrl),
        out_shape=jax.ShapeDtypeStruct((num_parts * 8, _LANES), jnp.float32),
        grid_spec=pltpu.PrefetchScalarGridSpec(
            num_scalar_prefetch=0,
            grid=(num_parts, bpp),
            in_specs=[
                pl.BlockSpec((br, _LANES), in_map),
                pl.BlockSpec((br, _LANES), in_map),
            ],
            out_specs=pl.BlockSpec((8, _LANES), lambda p, j: (p, 0)),
        ),
        compiler_params=pltpu.CompilerParams(
            dimension_semantics=("parallel", "arbitrary"),
            vmem_limit_bytes=32 * 1024 * 1024,
        ),
    )(scores_view, labels_view)
    # Each part holds an (8, 128) vreg-shaped partial sum; a tiny wrapper-side
    # reduce and the divide by the TRUE sample count finish the mean.
    return jnp.sum(partials) / n


def _reference(scores, labels, use_mrl):
    scores = jnp.asarray(scores, jnp.float32)
    y = jnp.asarray(labels, jnp.float32)
    x = -y * (scores[:, 0] - scores[:, 1])
    if use_mrl:
        return jnp.mean(jnp.maximum(0.0, x))
    return jnp.mean(jnp.maximum(x, 0.0) + jnp.log1p(jnp.exp(-jnp.abs(x))))


if __name__ == "__main__":
    key = jax.random.PRNGKey(0)

    ok = True
    # (N, block_rows): a row/lane-exact single-block case (zero-copy path), a tiny
    # ragged case (exercises padding + masking), and a multi-block case (exercises
    # the 2-D reduction grid and the per-part accumulators).
    for n, br in ((1024, 4096), (100, 4096), (8192, 32)):
        k1, k2 = jax.random.split(jax.random.fold_in(key, n))
        scores = jax.random.normal(k1, (n, 2), dtype=jnp.float32)
        labels = jnp.where(jax.random.bernoulli(k2, 0.5, (n,)), 1, -1).astype(jnp.int32)
        for use_mrl in (True, False):
            loss = contrastive_loss(scores, labels, use_mrl=use_mrl, block_rows=br)
            loss = jax.block_until_ready(loss)
            ref = _reference(scores, labels, use_mrl)
            if not jnp.allclose(loss, ref, atol=1e-5, rtol=1e-4):
                ok = False
                print(f"MISMATCH n={n} use_mrl={use_mrl}: kernel={float(loss)} ref={float(ref)}")

    if ok:
        print("KERNEL_OK")
</pallas_src>

<mosaic_0001>
module attributes {stable_mosaic.version = 11 : i64} {
  func.func @_contrastive_loss_kernel(%arg0: i32, %arg1: i32, %arg2: memref<16x128xf32, #tpu.memory_space<vmem>>, %arg3: memref<16x128xi8, #tpu.memory_space<vmem>>, %arg4: memref<8x128xf32, #tpu.memory_space<vmem>>) attributes {dimension_semantics = [#tpu.dimension_semantics<parallel>, #tpu.dimension_semantics<arbitrary>], iteration_bounds = array<i64: 1, 1>, scalar_prefetch = 0 : i64, scratch_operands = 0 : i64, tpu.core_type = #tpu.core_type<tc>, window_params = [{transform_indices = @transform_0, window_bounds = array<i64: 16, 128>}, {transform_indices = @transform_1, window_bounds = array<i64: 16, 128>}, {transform_indices = @transform_2, window_bounds = array<i64: 8, 128>}]} {
    %c0_i32 = arith.constant 0 : i32
    %0 = arith.cmpi eq, %arg1, %c0_i32 : i32
    %1 = arith.extui %0 : i1 to i32
    %c0_i32_0 = arith.constant 0 : i32
    %2 = arith.cmpi ne, %1, %c0_i32_0 : i32
    scf.if %2 {
      %cst_9 = arith.constant 0.000000e+00 : f32
      %16 = vector.broadcast %cst_9 : f32 to vector<8x128xf32>
      %c0_10 = arith.constant 0 : index
      %c0_11 = arith.constant 0 : index
      %17 = vector.load %arg4[%c0_10, %c0_11] : memref<8x128xf32, #tpu.memory_space<vmem>>, vector<8x128xf32>
      tpu.vector_store %arg4[%c0_10, %c0_11], %16 {strides = array<i32>} : memref<8x128xf32, #tpu.memory_space<vmem>>, vector<8x128xf32>,
    } else {
    }
    %c0 = arith.constant 0 : index
    %c0_1 = arith.constant 0 : index
    %3 = vector.load %arg2[%c0, %c0_1] : memref<16x128xf32, #tpu.memory_space<vmem>>, vector<16x128xf32>
    %c0_2 = arith.constant 0 : index
    %c0_3 = arith.constant 0 : index
    %4 = vector.load %arg3[%c0_2, %c0_3] : memref<16x128xi8, #tpu.memory_space<vmem>>, vector<16x128xi8>
    %5 = arith.sitofp %4 : vector<16x128xi8> to vector<16x128xf32>
    %c127_i32 = arith.constant 127 : i32
    %6 = tpu.dynamic_rotate %3 by %c127_i32 dim 1 : vector<16x128xf32>, i32 -> vector<16x128xf32>
    %7 = arith.subf %6, %3 : vector<16x128xf32>
    %8 = arith.mulf %7, %5 : vector<16x128xf32>
    %cst = arith.constant 0.000000e+00 : f32
    %9 = vector.broadcast %cst : f32 to vector<16x128xf32>
    %10 = arith.maximumf %8, %9 : vector<16x128xf32>
    %c0_4 = arith.constant 0 : index
    %c0_5 = arith.constant 0 : index
    %11 = vector.load %arg4[%c0_4, %c0_5] : memref<8x128xf32, #tpu.memory_space<vmem>>, vector<8x128xf32>
    %12 = vector.shape_cast %10 : vector<16x128xf32> to vector<2x8x128xf32>
    %cst_6 = arith.constant dense<0.000000e+00> : vector<8x128xf32>
    %13 = vector.multi_reduction <add>, %12, %cst_6 [0] : vector<2x8x128xf32> to vector<8x128xf32>
    %14 = arith.addf %11, %13 : vector<8x128xf32>
    %c0_7 = arith.constant 0 : index
    %c0_8 = arith.constant 0 : index
    %15 = vector.load %arg4[%c0_7, %c0_8] : memref<8x128xf32, #tpu.memory_space<vmem>>, vector<8x128xf32>
    tpu.vector_store %arg4[%c0_7, %c0_8], %14 {strides = array<i32>} : memref<8x128xf32, #tpu.memory_space<vmem>>, vector<8x128xf32>,
    return
  }
  func.func @transform_0(%arg0: i32, %arg1: i32) -> (i32, i32) {
    %c1_i32 = arith.constant 1 : i32
    %0 = arith.muli %arg0, %c1_i32 : i32
    %1 = arith.addi %0, %arg1 : i32
    %c0_i32 = arith.constant 0 : i32
    %c0_i32_0 = arith.constant 0 : i32
    return %1, %c0_i32 : i32, i32
  }
  func.func @transform_1(%arg0: i32, %arg1: i32) -> (i32, i32) {
    %c1_i32 = arith.constant 1 : i32
    %0 = arith.muli %arg0, %c1_i32 : i32
    %1 = arith.addi %0, %arg1 : i32
    %c0_i32 = arith.constant 0 : i32
    %c0_i32_0 = arith.constant 0 : i32
    return %1, %c0_i32 : i32, i32
  }
  func.func @transform_2(%arg0: i32, %arg1: i32) -> (i32, i32) {
    %c0_i32 = arith.constant 0 : i32
    %c0_i32_0 = arith.constant 0 : i32
    return %arg0, %c0_i32 : i32, i32
  }
}

</mosaic_0001>

<bundles_post_ra>
// kernel: tpu_custom_call.1
= control target key start
LH: loop header
LB: loop body
LE: loop exit
PB: predicated region body
PF: predicated region fallthrough
CT: control target
= control target key end

     0   :  { %7 = vsyncpa [#allocation3], 0  ;;  %s239_s0 = inlined_call_operand.hbm [shape: f32[16,128], index: 0, kind: input, shape index: {}]   ;;  %s240_s1 = inlined_call_operand.hbm [shape: s8[16,128], index: 1, kind: input, shape index: {}]   ;;  %s241_s2 = inlined_call_operand.hbm [shape: f32[8,128], index: 2, kind: output, shape index: {}]  }
   0x1   :  { %8 = vsyncpa [#allocation6], 0 }
   0x2   :  { %9 = vsyncpa [#allocation4], 0  ;;  %s180_s9 = smov [#allocation2]   ;;  %s108_s13 = scalar_lea.hbm %s239_s0, 256 }
   0x3   :  { %s19_s10 = sshll.u32 %s180_s9, 4  ;;  %p109_p0 = scmp.ne.s32.totalorder %s239_s0, %s108_s13  ;;  %s20_s10 = int_to_ptr.vmem [resolvable:$true] %s19_s10 }
   0x4   :  { %p112_p1 = scmp.lt.u32.totalorder %s108_s13, %s239_s0 }
   0x6   :  { %p114_p2 = pnand %p112_p1, %p109_p0 }
   0x8   :  { %117 = shalt.err (!%p114_p2)
}
   0x9   :  { %s118_s18 = scalar_lea.vmem %s20_s10, 256  ;;  %p123_p4 = scmp.lt.s32.totalorder %s20_s10, %s20_s10 }
   0xa   :  { %p119_p3 = scmp.ne.s32.totalorder %s20_s10, %s118_s18  ;;  %p124_p5 = scmp.lt.s32.totalorder %s118_s18, %s118_s18 }
   0xc   :  { %p125_p6 = por %p124_p5, %p123_p4 }
   0xe   :  { %p126_p7 = pnand %p125_p6, %p119_p3 }
  0x10   :  { %129 = shalt.err (!%p126_p7)
}
  0x11   :  { %s181_s19 = smov 128   ;;  %s182_s20 = smov 8  }
  0x12   :  { %25 = dma.hbm_to_vmem [thread:$0]  %s239_s0, 256, %s20_s10, [#allocation3], %s181_s19, %s181_s19, %s182_s20  }
  0x13   :  { %s183_s23 = smov [#allocation5]   ;;  %s130_s27 = scalar_lea.hbm %s240_s1, 64 }
  0x14   :  { %s35_s24 = sshll.u32 %s183_s23, 4  ;;  %p131_p8 = scmp.ne.s32.totalorder %s240_s1, %s130_s27  ;;  %s36_s24 = int_to_ptr.vmem [resolvable:$true] %s35_s24 }
  0x15   :  { %p134_p9 = scmp.lt.u32.totalorder %s130_s27, %s240_s1 }
  0x17   :  { %p136_p10 = pnand %p134_p9, %p131_p8 }
  0x19   :  { %139 = shalt.err (!%p136_p10)
}
  0x1a   :  { %s140_s4 = scalar_lea.vmem %s36_s24, 64  ;;  %p145_p12 = scmp.lt.s32.totalorder %s36_s24, %s36_s24 }
  0x1b   :  { %p141_p11 = scmp.ne.s32.totalorder %s36_s24, %s140_s4  ;;  %p146_p13 = scmp.lt.s32.totalorder %s140_s4, %s140_s4 }
  0x1d   :  { %p147_p0 = por %p146_p13, %p145_p12 }
  0x1f   :  { %p148_p1 = pnand %p147_p0, %p141_p11 }
  0x21   :  { %151 = shalt.err (!%p148_p1)
}
  0x22   :  { %s184_s0 = smov 32   ;;  %s185_s5 = smov 2  }
  0x23   :  { %41 = dma.hbm_to_vmem [thread:$0]  %s240_s1, 64, %s36_s24, [#allocation6], %s184_s0, %s184_s0, %s185_s5  }
  0x24   :  { %174 = dma.done.wait [#allocation3], 256  }
  0x25   :  { %175 = vsyncadd [#allocation3], 4294967040 }
  0x26   :  { %176 = dma.done.wait [#allocation6], 64  }
  0x27   :  { %177 = vsyncadd [#allocation6], 4294967232  ;;  %v57_v0 = vld [vmem:[#allocation2] sm:$0xff]  ;;  %s186_s8 = smov 127   ;;  %v58_v1 = vld [vmem:[#allocation2 + $0x8] sm:$0xff]  ;;  %s187_s1 = smov [#allocation7]  }
  0x28   :  { %65 = vrot.lane.b32.xlu0 %v57_v0, %s186_s8  ;;  %v96_v2 = vld [vmem:[#allocation5] sm:$0xf]   ;;  %s85_s9 = sshll.u32 %s187_s1, 4  ;;  %s86_s9 = int_to_ptr.vmem [resolvable:$true] %s85_s9 }
  0x29   :  { %v97_v3 = vunpack.c.0.s8 %v96_v2  ;;  %v98_v4 = vunpack.c.1.s8 %v96_v2  ;;  %s152_s10 = scalar_lea.vmem %s86_s9, 128  ;;  %p157_p3 = scmp.lt.s32.totalorder %s86_s9, %s86_s9 }
  0x2a   :  { %p153_p2 = scmp.ne.s32.totalorder %s86_s9, %s152_s10  ;;  %p158_p4 = scmp.lt.s32.totalorder %s152_s10, %s152_s10 }
  0x2b   :  { %v63_v6 = vcvt.s32.f32 %v97_v3  ;;  %v64_v8 = vcvt.s32.f32 %v98_v4 }
  0x2c   :  { %67 = vrot.lane.b32.xlu0 %v58_v1, %s186_s8  ;;  %p159_p5 = por %p158_p4, %p157_p3 }
  0x2e   :  { %p160_p6 = pnand %p159_p5, %p153_p2 }
  0x9a   :  { %v66_v5 = vpop.permute.xlu0 %65 }
  0x9b   :  { %v69_v7 = vsub.f32 %v66_v5, %v57_v0 }
  0x9d   :  { %v71_v10 = vmul.f32 %v69_v7, %v63_v6 }
  0x9e   :  { %v68_v9 = vpop.permute.xlu0 %67 }
  0x9f   :  { %v70_v11 = vsub.f32 %v68_v9, %v58_v1  ;;  %v73_v13 = vmax.f32 %v71_v10, 0.0 }
  0xa1   :  { %v72_v12 = vmul.f32 %v70_v11, %v64_v8 }
  0xa3   :  { %v74_v14 = vmax.f32 %v72_v12, 0.0 }
  0xa5   :  { %v76_v15 = vadd.f32 %v74_v14, %v73_v13 }
  0xa7   :  { %78 = vst [vmem:[#allocation7] sm:$0xff] %v76_v15 }
  0xa8   :  { %163 = shalt.err (!%p160_p6)
}
  0xa9   :  { %s164_s13 = scalar_lea.hbm %s241_s2, 128 }
  0xaa   :  { %p165_p7 = scmp.ne.s32.totalorder %s241_s2, %s164_s13  ;;  %p168_p8 = scmp.lt.u32.totalorder %s164_s13, %s241_s2 }
  0xac   :  { %p170_p9 = pnand %p168_p8, %p165_p7 }
  0xae   :  { %173 = shalt.err (!%p170_p9)
}
  0xaf   :  { %88 = dma.vmem_to_hbm [thread:$0]  %s86_s9, 128, %s241_s2, [#allocation4]  }
  0xb0   :  { %178 = dma.done.wait [#allocation4], 128  }
  0xb1   :  { %179 = vsyncadd [#allocation4], 4294967168 }
  0xb2   :  { %92 = vsyncpa [#allocation3], 1 }
  0xb3   :  { %93 = vsyncpa [#allocation6], 1 }
  0xb4   :  { %94 = vsyncpa [#allocation4], 1 }

</bundles_post_ra>
